<compile_context>
chip_gen: v7x
topology: tpu7x:2x2x1
jax: 0.10.0
libtpu: 0.0.40
codegen_flags: <defaults>
</compile_context>

<pallas_src>
import numpy as np
import jax
import jax.numpy as jnp
from jax.experimental import pallas as pl
from jax.experimental.pallas import tpu as pltpu

EPS = 1e-15
MAX_LOGPROB = 50.0
TOL = 0.001

SUBLANES = 8
MAX_LANE_TILE = 2048   # (8, 2048) f32 block = 64 KiB/operand; 4 operands x 2 buffers
                       # ~= 0.5 MiB -> comfortably inside every scoped-VMEM default.

# Lanczos approximation (g = 7, 9 coefficients).
_LANCZOS_G = 7.0
_HALF_LOG_2PI = 0.9189385332046727   # 0.5 * log(2*pi)
_LANCZOS_C = (
    0.99999999999980993,
    676.5203681218851,
    -1259.1392167224028,
    771.32342877765313,
    -176.61502916214059,
    12.507343278686905,
    -0.13857109526572012,
    9.9843695780195716e-6,
    1.5056327351493116e-7,
)


def _lanczos_rational_coeffs():
    """Fold A(x) = c0 + sum_{k=1..8} c_k / (x + k) into one rational P(x)/Q(x).

    Coefficients are computed in float64 at import time (descending powers), so
    the in-kernel evaluation is two Horner chains + a single divide."""
    q = np.array([1.0])
    for i in range(1, 9):
        q = np.polymul(q, [1.0, float(i)])
    p = _LANCZOS_C[0] * q
    for k in range(1, 9):
        r = np.array([1.0])
        for j in range(1, 9):
            if j != k:
                r = np.polymul(r, [1.0, float(j)])
        p = np.polyadd(p, _LANCZOS_C[k] * r)
    return tuple(float(v) for v in p), tuple(float(v) for v in q)


_P_COEFFS, _Q_COEFFS = _lanczos_rational_coeffs()


def _horner(coeffs, x):
    acc = coeffs[0] * x + coeffs[1]
    for c in coeffs[2:]:
        acc = acc * x + c
    return acc


def _lgamma_sum(a, b):
    """lgamma(a) + lgamma(b) for a, b > 0, sharing log evaluations.

    Uses lgamma(v) = lgamma(v + 1) - log(v) so the Lanczos rational is always
    evaluated at an argument >= 1 (lax.lgamma has no Mosaic lowering)."""
    ra = _horner(_P_COEFFS, a) / _horner(_Q_COEFFS, a)
    rb = _horner(_P_COEFFS, b) / _horner(_Q_COEFFS, b)
    ta = a + (_LANCZOS_G + 0.5)
    tb = b + (_LANCZOS_G + 0.5)
    return (2.0 * _HALF_LOG_2PI
            + (a + 0.5) * jnp.log(ta) + (b + 0.5) * jnp.log(tb)
            - ta - tb
            + jnp.log(ra * rb)      # = log A(a) + log A(b)   (fused)
            - jnp.log(a * b))       # = log a + log b         (shift correction, fused)


def _beta_prior_decoder_kernel(params_ref, logits_ref, logdiff_ref, ea_ref, out_ref):
    """params_ref  : SMEM f32[4]      -> [precision, gamma, N, lgamma(precision+N+2*EPS)]
       logits_ref  : VMEM f32[8, TE]  -> <z[src], z[dst]> per edge
       logdiff_ref : VMEM f32[8, TE]  -> log(|dst - src| + 1)
       ea_ref      : VMEM f32[8, TE]  -> edge_attr
       out_ref     : VMEM f32[8, TE]  -> clamp(-Beta(alpha, beta).log_prob(edge_attr), max=50)
    """
    precision = params_ref[0]
    gamma = params_ref[1]
    n_scale = params_ref[2]
    lg_ab = params_ref[3]                                  # edge-independent lgamma(alpha+beta)

    p = 1.0 / (1.0 + jnp.exp(-logits_ref[...]))            # sigmoid of the per-edge dot product
    diff_pow = jnp.exp(-gamma * logdiff_ref[...])          # diff ** (-exp(loggamma))

    prior_alpha = diff_pow * precision
    pn = p * n_scale
    alpha = prior_alpha + pn + EPS
    beta = (precision - prior_alpha) + (n_scale - pn) + EPS

    x = jnp.clip(ea_ref[...], TOL, 1.0 - TOL)
    log_pdf = ((alpha - 1.0) * jnp.log(x)
               + (beta - 1.0) * jnp.log(1.0 - x)
               + lg_ab
               - _lgamma_sum(alpha, beta))

    out_ref[...] = jnp.minimum(-log_pdf, MAX_LOGPROB)


@jax.jit
def beta_prior_decoder_forward(z, edge_index, edge_attr, logprecision, loggamma, logN):
    """Pallas implementation of BetaPriorDecoder.forward (cdf_tol=None path).

    The PyTorch CHUNKSIZE loop is an implementation detail; the fully vectorized
    result is identical."""
    E = edge_index.shape[1]

    ei = edge_index.astype(jnp.int32)
    z32 = z.astype(jnp.float32)

    # Per-edge reductions precomputed in XLA -> kernel streams only 3 f32 / edge.
    logits = jnp.sum(z32[ei[0]] * z32[ei[1]], axis=1)                      # [E]
    log_diff = jnp.log((jnp.abs(ei[1] - ei[0]) + 1).astype(jnp.float32))   # [E]
    ea = jnp.reshape(edge_attr, (-1,)).astype(jnp.float32)                 # squeeze -> [E]

    # Scalar parameters (+ hoisted lgamma(alpha+beta)) for SMEM.
    precision = jnp.exp(logprecision.astype(jnp.float32).reshape(1))
    gamma = jnp.exp(loggamma.astype(jnp.float32).reshape(1))
    n_scale = jnp.exp(logN.astype(jnp.float32).reshape(1))
    lg_ab = jax.lax.lgamma(precision + n_scale + 2.0 * EPS)
    params = jnp.concatenate([precision, gamma, n_scale, lg_ab])           # (4,)

    # Sublane + lane dense packing of the edge axis: pad to a multiple of
    # 8 * lane_tile and view as (8, E_pad / 8); grid over lane tiles.
    lanes_needed = -(-E // SUBLANES)
    lane_tile = min(MAX_LANE_TILE, max(128, -(-lanes_needed // 128) * 128))
    block = SUBLANES * lane_tile
    e_pad = -(-E // block) * block
    n_tiles = e_pad // block
    n_lanes = e_pad // SUBLANES

    def pack(v, fill):
        return jnp.pad(v, (0, e_pad - E), constant_values=fill).reshape(SUBLANES, n_lanes)

    logits_p = pack(logits, 0.0)     # pad -> p = 0.5           (finite, discarded)
    logdiff_p = pack(log_diff, 0.0)  # pad -> diff = 1          (finite, discarded)
    ea_p = pack(ea, 0.5)             # pad -> mid-interval attr (finite, discarded)

    edge_spec = pl.BlockSpec((SUBLANES, lane_tile), lambda i: (0, i))

    out = pl.pallas_call(
        _beta_prior_decoder_kernel,
        out_shape=jax.ShapeDtypeStruct((SUBLANES, n_lanes), jnp.float32),
        grid_spec=pltpu.PrefetchScalarGridSpec(
            num_scalar_prefetch=0,
            grid=(n_tiles,),
            in_specs=[
                pl.BlockSpec(memory_space=pltpu.MemorySpace.SMEM),   # params (untiled)
                edge_spec,                                           # logits
                edge_spec,                                           # log_diff
                edge_spec,                                           # edge_attr
            ],
            out_specs=edge_spec,
        ),
        compiler_params=pltpu.CompilerParams(
            dimension_semantics=("parallel",)),
    )(params, logits_p, logdiff_p, ea_p)

    return out.reshape(e_pad)[:E]


def _reference_forward(z, edge_index, edge_attr, logprecision, loggamma, logN):
    """Pure-JAX reference mirroring the PyTorch semantics (for verification)."""
    ei = edge_index
    z32 = z.astype(jnp.float32)
    diff = (jnp.abs(ei[1] - ei[0]) + 1).astype(jnp.float32)
    p = jax.nn.sigmoid(jnp.sum(z32[ei[0]] * z32[ei[1]], axis=1))
    diff_pow = diff ** (-jnp.exp(loggamma))
    prior_alpha = diff_pow * jnp.exp(logprecision)
    prior_beta = (1.0 - diff_pow) * jnp.exp(logprecision)
    alpha = prior_alpha + p * jnp.exp(logN) + EPS
    beta = prior_beta + (1.0 - p) * jnp.exp(logN) + EPS
    x = jnp.clip(jnp.squeeze(edge_attr), TOL, 1.0 - TOL)
    log_pdf = ((alpha - 1.0) * jnp.log(x)
               + (beta - 1.0) * jnp.log(1.0 - x)
               + jax.lax.lgamma(alpha + beta)
               - jax.lax.lgamma(alpha)
               - jax.lax.lgamma(beta))
    return jnp.minimum(-log_pdf, MAX_LOGPROB)


if __name__ == "__main__":
    key = jax.random.PRNGKey(0)
    k_z, k_ei, k_ea = jax.random.split(key, 3)

    N, D, E = 16, 8, 24                       # 16 nodes, latent dim 8, 24 edges
    z = jax.random.normal(k_z, (N, D), dtype=jnp.float32)
    edge_index = jax.random.randint(k_ei, (2, E), 0, N, dtype=jnp.int32)
    edge_attr = jax.random.uniform(k_ea, (E, 1), dtype=jnp.float32)

    # module defaults: tensor([1.0]) each
    logprecision = jnp.array([1.0], dtype=jnp.float32)
    loggamma = jnp.array([1.0], dtype=jnp.float32)
    logN = jnp.array([1.0], dtype=jnp.float32)

    out = beta_prior_decoder_forward(z, edge_index, edge_attr,
                                     logprecision, loggamma, logN)
    out = jax.block_until_ready(out)

    ref = _reference_forward(z, edge_index, edge_attr,
                             logprecision, loggamma, logN)
    assert out.shape == (E,)
    assert jnp.max(jnp.abs(out - ref)) < 1e-2, "mismatch vs pure-JAX reference"

    print("KERNEL_OK")
</pallas_src>

<mosaic_0001>
module attributes {stable_mosaic.version = 11 : i64} {
  func.func @_beta_prior_decoder_kernel(%arg0: i32, %arg1: memref<4xf32, #tpu.memory_space<smem>>, %arg2: memref<8x128xf32, #tpu.memory_space<vmem>>, %arg3: memref<8x128xf32, #tpu.memory_space<vmem>>, %arg4: memref<8x128xf32, #tpu.memory_space<vmem>>, %arg5: memref<8x128xf32, #tpu.memory_space<vmem>>) attributes {dimension_semantics = [#tpu.dimension_semantics<parallel>], iteration_bounds = array<i64: 1>, scalar_prefetch = 0 : i64, scratch_operands = 0 : i64, tpu.core_type = #tpu.core_type<tc>, window_params = [{transform_indices = @transform_0, window_bounds = array<i64: 4>}, {transform_indices = @transform_1, window_bounds = array<i64: 8, 128>}, {transform_indices = @transform_2, window_bounds = array<i64: 8, 128>}, {transform_indices = @transform_3, window_bounds = array<i64: 8, 128>}, {transform_indices = @transform_4, window_bounds = array<i64: 8, 128>}]} {
    %c0 = arith.constant 0 : index
    %0 = memref.load %arg1[%c0] : memref<4xf32, #tpu.memory_space<smem>>
    %c1 = arith.constant 1 : index
    %1 = memref.load %arg1[%c1] : memref<4xf32, #tpu.memory_space<smem>>
    %c2 = arith.constant 2 : index
    %2 = memref.load %arg1[%c2] : memref<4xf32, #tpu.memory_space<smem>>
    %c3 = arith.constant 3 : index
    %3 = memref.load %arg1[%c3] : memref<4xf32, #tpu.memory_space<smem>>
    %c0_0 = arith.constant 0 : index
    %c0_1 = arith.constant 0 : index
    %4 = vector.load %arg2[%c0_0, %c0_1] : memref<8x128xf32, #tpu.memory_space<vmem>>, vector<8x128xf32>
    %cst = arith.constant 0.000000e+00 : f32
    %5 = vector.broadcast %cst : f32 to vector<8x128xf32>
    %6 = arith.subf %5, %4 : vector<8x128xf32>
    %7 = math.exp %6 : vector<8x128xf32>
    %cst_2 = arith.constant 1.000000e+00 : f32
    %8 = vector.broadcast %cst_2 : f32 to vector<8x128xf32>
    %9 = arith.addf %8, %7 : vector<8x128xf32>
    %cst_3 = arith.constant 1.000000e+00 : f32
    %10 = vector.broadcast %cst_3 : f32 to vector<8x128xf32>
    %11 = arith.divf %10, %9 : vector<8x128xf32>
    %cst_4 = arith.constant 0.000000e+00 : f32
    %12 = arith.subf %cst_4, %1 : f32
    %c0_5 = arith.constant 0 : index
    %c0_6 = arith.constant 0 : index
    %13 = vector.load %arg3[%c0_5, %c0_6] : memref<8x128xf32, #tpu.memory_space<vmem>>, vector<8x128xf32>
    %14 = vector.broadcast %12 : f32 to vector<8x128xf32>
    %15 = arith.mulf %14, %13 : vector<8x128xf32>
    %16 = math.exp %15 : vector<8x128xf32>
    %17 = vector.broadcast %0 : f32 to vector<8x128xf32>
    %18 = arith.mulf %16, %17 : vector<8x128xf32>
    %19 = vector.broadcast %2 : f32 to vector<8x128xf32>
    %20 = arith.mulf %11, %19 : vector<8x128xf32>
    %21 = arith.addf %18, %20 : vector<8x128xf32>
    %cst_7 = arith.constant 1.000000e-15 : f32
    %22 = vector.broadcast %cst_7 : f32 to vector<8x128xf32>
    %23 = arith.addf %21, %22 : vector<8x128xf32>
    %24 = vector.broadcast %0 : f32 to vector<8x128xf32>
    %25 = arith.subf %24, %18 : vector<8x128xf32>
    %26 = vector.broadcast %2 : f32 to vector<8x128xf32>
    %27 = arith.subf %26, %20 : vector<8x128xf32>
    %28 = arith.addf %25, %27 : vector<8x128xf32>
    %cst_8 = arith.constant 1.000000e-15 : f32
    %29 = vector.broadcast %cst_8 : f32 to vector<8x128xf32>
    %30 = arith.addf %28, %29 : vector<8x128xf32>
    %c0_9 = arith.constant 0 : index
    %c0_10 = arith.constant 0 : index
    %31 = vector.load %arg4[%c0_9, %c0_10] : memref<8x128xf32, #tpu.memory_space<vmem>>, vector<8x128xf32>
    %cst_11 = arith.constant 1.000000e-03 : f32
    %cst_12 = arith.constant 9.990000e-01 : f32
    %32 = vector.broadcast %cst_11 : f32 to vector<8x128xf32>
    %33 = arith.maximumf %32, %31 : vector<8x128xf32>
    %34 = vector.broadcast %cst_12 : f32 to vector<8x128xf32>
    %35 = arith.minimumf %34, %33 : vector<8x128xf32>
    %cst_13 = arith.constant 1.000000e+00 : f32
    %36 = vector.broadcast %cst_13 : f32 to vector<8x128xf32>
    %37 = arith.subf %23, %36 : vector<8x128xf32>
    %38 = math.log %35 : vector<8x128xf32>
    %39 = arith.mulf %37, %38 : vector<8x128xf32>
    %cst_14 = arith.constant 1.000000e+00 : f32
    %40 = vector.broadcast %cst_14 : f32 to vector<8x128xf32>
    %41 = arith.subf %30, %40 : vector<8x128xf32>
    %cst_15 = arith.constant 1.000000e+00 : f32
    %42 = vector.broadcast %cst_15 : f32 to vector<8x128xf32>
    %43 = arith.subf %42, %35 : vector<8x128xf32>
    %44 = math.log %43 : vector<8x128xf32>
    %45 = arith.mulf %41, %44 : vector<8x128xf32>
    %46 = arith.addf %39, %45 : vector<8x128xf32>
    %47 = vector.broadcast %3 : f32 to vector<8x128xf32>
    %48 = arith.addf %46, %47 : vector<8x128xf32>
    %cst_16 = arith.constant 1.000000e+00 : f32
    %49 = vector.broadcast %cst_16 : f32 to vector<8x128xf32>
    %50 = arith.mulf %49, %23 : vector<8x128xf32>
    %cst_17 = arith.constant 60.4583321 : f32
    %51 = vector.broadcast %cst_17 : f32 to vector<8x128xf32>
    %52 = arith.addf %50, %51 : vector<8x128xf32>
    %53 = arith.mulf %52, %23 : vector<8x128xf32>
    %cst_18 = arith.constant 1599.04248 : f32
    %54 = vector.broadcast %cst_18 : f32 to vector<8x128xf32>
    %55 = arith.addf %53, %54 : vector<8x128xf32>
    %56 = arith.mulf %55, %23 : vector<8x128xf32>
    %cst_19 = arith.constant 24165.5098 : f32
    %57 = vector.broadcast %cst_19 : f32 to vector<8x128xf32>
    %58 = arith.addf %56, %57 : vector<8x128xf32>
    %59 = arith.mulf %58, %23 : vector<8x128xf32>
    %cst_20 = arith.constant 228235.219 : f32
    %60 = vector.broadcast %cst_20 : f32 to vector<8x128xf32>
    %61 = arith.addf %59, %60 : vector<8x128xf32>
    %62 = arith.mulf %61, %23 : vector<8x128xf32>
    %cst_21 = arith.constant 1379496.25 : f32
    %63 = vector.broadcast %cst_21 : f32 to vector<8x128xf32>
    %64 = arith.addf %62, %63 : vector<8x128xf32>
    %65 = arith.mulf %64, %23 : vector<8x128xf32>
    %cst_22 = arith.constant 0x4A9F05EA : f32
    %66 = vector.broadcast %cst_22 : f32 to vector<8x128xf32>
    %67 = arith.addf %65, %66 : vector<8x128xf32>
    %68 = arith.mulf %67, %23 : vector<8x128xf32>
    %cst_23 = arith.constant 0x4B2B9D51 : f32
    %69 = vector.broadcast %cst_23 : f32 to vector<8x128xf32>
    %70 = arith.addf %68, %69 : vector<8x128xf32>
    %71 = arith.mulf %70, %23 : vector<8x128xf32>
    %cst_24 = arith.constant 0x4B220ADA : f32
    %72 = vector.broadcast %cst_24 : f32 to vector<8x128xf32>
    %73 = arith.addf %71, %72 : vector<8x128xf32>
    %cst_25 = arith.constant 1.000000e+00 : f32
    %74 = vector.broadcast %cst_25 : f32 to vector<8x128xf32>
    %75 = arith.mulf %74, %23 : vector<8x128xf32>
    %cst_26 = arith.constant 3.600000e+01 : f32
    %76 = vector.broadcast %cst_26 : f32 to vector<8x128xf32>
    %77 = arith.addf %75, %76 : vector<8x128xf32>
    %78 = arith.mulf %77, %23 : vector<8x128xf32>
    %cst_27 = arith.constant 5.460000e+02 : f32
    %79 = vector.broadcast %cst_27 : f32 to vector<8x128xf32>
    %80 = arith.addf %78, %79 : vector<8x128xf32>
    %81 = arith.mulf %80, %23 : vector<8x128xf32>
    %cst_28 = arith.constant 4.536000e+03 : f32
    %82 = vector.broadcast %cst_28 : f32 to vector<8x128xf32>
    %83 = arith.addf %81, %82 : vector<8x128xf32>
    %84 = arith.mulf %83, %23 : vector<8x128xf32>
    %cst_29 = arith.constant 2.244900e+04 : f32
    %85 = vector.broadcast %cst_29 : f32 to vector<8x128xf32>
    %86 = arith.addf %84, %85 : vector<8x128xf32>
    %87 = arith.mulf %86, %23 : vector<8x128xf32>
    %cst_30 = arith.constant 6.728400e+04 : f32
    %88 = vector.broadcast %cst_30 : f32 to vector<8x128xf32>
    %89 = arith.addf %87, %88 : vector<8x128xf32>
    %90 = arith.mulf %89, %23 : vector<8x128xf32>
    %cst_31 = arith.constant 1.181240e+05 : f32
    %91 = vector.broadcast %cst_31 : f32 to vector<8x128xf32>
    %92 = arith.addf %90, %91 : vector<8x128xf32>
    %93 = arith.mulf %92, %23 : vector<8x128xf32>
    %cst_32 = arith.constant 1.095840e+05 : f32
    %94 = vector.broadcast %cst_32 : f32 to vector<8x128xf32>
    %95 = arith.addf %93, %94 : vector<8x128xf32>
    %96 = arith.mulf %95, %23 : vector<8x128xf32>
    %cst_33 = arith.constant 4.032000e+04 : f32
    %97 = vector.broadcast %cst_33 : f32 to vector<8x128xf32>
    %98 = arith.addf %96, %97 : vector<8x128xf32>
    %99 = arith.divf %73, %98 : vector<8x128xf32>
    %cst_34 = arith.constant 1.000000e+00 : f32
    %100 = vector.broadcast %cst_34 : f32 to vector<8x128xf32>
    %101 = arith.mulf %100, %30 : vector<8x128xf32>
    %cst_35 = arith.constant 60.4583321 : f32
    %102 = vector.broadcast %cst_35 : f32 to vector<8x128xf32>
    %103 = arith.addf %101, %102 : vector<8x128xf32>
    %104 = arith.mulf %103, %30 : vector<8x128xf32>
    %cst_36 = arith.constant 1599.04248 : f32
    %105 = vector.broadcast %cst_36 : f32 to vector<8x128xf32>
    %106 = arith.addf %104, %105 : vector<8x128xf32>
    %107 = arith.mulf %106, %30 : vector<8x128xf32>
    %cst_37 = arith.constant 24165.5098 : f32
    %108 = vector.broadcast %cst_37 : f32 to vector<8x128xf32>
    %109 = arith.addf %107, %108 : vector<8x128xf32>
    %110 = arith.mulf %109, %30 : vector<8x128xf32>
    %cst_38 = arith.constant 228235.219 : f32
    %111 = vector.broadcast %cst_38 : f32 to vector<8x128xf32>
    %112 = arith.addf %110, %111 : vector<8x128xf32>
    %113 = arith.mulf %112, %30 : vector<8x128xf32>
    %cst_39 = arith.constant 1379496.25 : f32
    %114 = vector.broadcast %cst_39 : f32 to vector<8x128xf32>
    %115 = arith.addf %113, %114 : vector<8x128xf32>
    %116 = arith.mulf %115, %30 : vector<8x128xf32>
    %cst_40 = arith.constant 0x4A9F05EA : f32
    %117 = vector.broadcast %cst_40 : f32 to vector<8x128xf32>
    %118 = arith.addf %116, %117 : vector<8x128xf32>
    %119 = arith.mulf %118, %30 : vector<8x128xf32>
    %cst_41 = arith.constant 0x4B2B9D51 : f32
    %120 = vector.broadcast %cst_41 : f32 to vector<8x128xf32>
    %121 = arith.addf %119, %120 : vector<8x128xf32>
    %122 = arith.mulf %121, %30 : vector<8x128xf32>
    %cst_42 = arith.constant 0x4B220ADA : f32
    %123 = vector.broadcast %cst_42 : f32 to vector<8x128xf32>
    %124 = arith.addf %122, %123 : vector<8x128xf32>
    %cst_43 = arith.constant 1.000000e+00 : f32
    %125 = vector.broadcast %cst_43 : f32 to vector<8x128xf32>
    %126 = arith.mulf %125, %30 : vector<8x128xf32>
    %cst_44 = arith.constant 3.600000e+01 : f32
    %127 = vector.broadcast %cst_44 : f32 to vector<8x128xf32>
    %128 = arith.addf %126, %127 : vector<8x128xf32>
    %129 = arith.mulf %128, %30 : vector<8x128xf32>
    %cst_45 = arith.constant 5.460000e+02 : f32
    %130 = vector.broadcast %cst_45 : f32 to vector<8x128xf32>
    %131 = arith.addf %129, %130 : vector<8x128xf32>
    %132 = arith.mulf %131, %30 : vector<8x128xf32>
    %cst_46 = arith.constant 4.536000e+03 : f32
    %133 = vector.broadcast %cst_46 : f32 to vector<8x128xf32>
    %134 = arith.addf %132, %133 : vector<8x128xf32>
    %135 = arith.mulf %134, %30 : vector<8x128xf32>
    %cst_47 = arith.constant 2.244900e+04 : f32
    %136 = vector.broadcast %cst_47 : f32 to vector<8x128xf32>
    %137 = arith.addf %135, %136 : vector<8x128xf32>
    %138 = arith.mulf %137, %30 : vector<8x128xf32>
    %cst_48 = arith.constant 6.728400e+04 : f32
    %139 = vector.broadcast %cst_48 : f32 to vector<8x128xf32>
    %140 = arith.addf %138, %139 : vector<8x128xf32>
    %141 = arith.mulf %140, %30 : vector<8x128xf32>
    %cst_49 = arith.constant 1.181240e+05 : f32
    %142 = vector.broadcast %cst_49 : f32 to vector<8x128xf32>
    %143 = arith.addf %141, %142 : vector<8x128xf32>
    %144 = arith.mulf %143, %30 : vector<8x128xf32>
    %cst_50 = arith.constant 1.095840e+05 : f32
    %145 = vector.broadcast %cst_50 : f32 to vector<8x128xf32>
    %146 = arith.addf %144, %145 : vector<8x128xf32>
    %147 = arith.mulf %146, %30 : vector<8x128xf32>
    %cst_51 = arith.constant 4.032000e+04 : f32
    %148 = vector.broadcast %cst_51 : f32 to vector<8x128xf32>
    %149 = arith.addf %147, %148 : vector<8x128xf32>
    %150 = arith.divf %124, %149 : vector<8x128xf32>
    %cst_52 = arith.constant 7.500000e+00 : f32
    %151 = vector.broadcast %cst_52 : f32 to vector<8x128xf32>
    %152 = arith.addf %23, %151 : vector<8x128xf32>
    %cst_53 = arith.constant 7.500000e+00 : f32
    %153 = vector.broadcast %cst_53 : f32 to vector<8x128xf32>
    %154 = arith.addf %30, %153 : vector<8x128xf32>
    %cst_54 = arith.constant 5.000000e-01 : f32
    %155 = vector.broadcast %cst_54 : f32 to vector<8x128xf32>
    %156 = arith.addf %23, %155 : vector<8x128xf32>
    %157 = math.log %152 : vector<8x128xf32>
    %158 = arith.mulf %156, %157 : vector<8x128xf32>
    %cst_55 = arith.constant 1.83787704 : f32
    %159 = vector.broadcast %cst_55 : f32 to vector<8x128xf32>
    %160 = arith.addf %159, %158 : vector<8x128xf32>
    %cst_56 = arith.constant 5.000000e-01 : f32
    %161 = vector.broadcast %cst_56 : f32 to vector<8x128xf32>
    %162 = arith.addf %30, %161 : vector<8x128xf32>
    %163 = math.log %154 : vector<8x128xf32>
    %164 = arith.mulf %162, %163 : vector<8x128xf32>
    %165 = arith.addf %160, %164 : vector<8x128xf32>
    %166 = arith.subf %165, %152 : vector<8x128xf32>
    %167 = arith.subf %166, %154 : vector<8x128xf32>
    %168 = arith.mulf %99, %150 : vector<8x128xf32>
    %169 = math.log %168 : vector<8x128xf32>
    %170 = arith.addf %167, %169 : vector<8x128xf32>
    %171 = arith.mulf %23, %30 : vector<8x128xf32>
    %172 = math.log %171 : vector<8x128xf32>
    %173 = arith.subf %170, %172 : vector<8x128xf32>
    %174 = arith.subf %48, %173 : vector<8x128xf32>
    %cst_57 = arith.constant 0.000000e+00 : f32
    %175 = vector.broadcast %cst_57 : f32 to vector<8x128xf32>
    %176 = arith.subf %175, %174 : vector<8x128xf32>
    %cst_58 = arith.constant 5.000000e+01 : f32
    %177 = vector.broadcast %cst_58 : f32 to vector<8x128xf32>
    %178 = arith.minimumf %176, %177 : vector<8x128xf32>
    %c0_59 = arith.constant 0 : index
    %c0_60 = arith.constant 0 : index
    %179 = vector.load %arg5[%c0_59, %c0_60] : memref<8x128xf32, #tpu.memory_space<vmem>>, vector<8x128xf32>
    tpu.vector_store %arg5[%c0_59, %c0_60], %178 {strides = array<i32>} : memref<8x128xf32, #tpu.memory_space<vmem>>, vector<8x128xf32>,
    return
  }
  func.func @transform_0(%arg0: i32) -> i32 {
    %c0_i32 = arith.constant 0 : i32
    %c0_i32_0 = arith.constant 0 : i32
    return %c0_i32 : i32
  }
  func.func @transform_1(%arg0: i32) -> (i32, i32) {
    %c0_i32 = arith.constant 0 : i32
    %c0_i32_0 = arith.constant 0 : i32
    return %c0_i32, %arg0 : i32, i32
  }
  func.func @transform_2(%arg0: i32) -> (i32, i32) {
    %c0_i32 = arith.constant 0 : i32
    %c0_i32_0 = arith.constant 0 : i32
    return %c0_i32, %arg0 : i32, i32
  }
  func.func @transform_3(%arg0: i32) -> (i32, i32) {
    %c0_i32 = arith.constant 0 : i32
    %c0_i32_0 = arith.constant 0 : i32
    return %c0_i32, %arg0 : i32, i32
  }
  func.func @transform_4(%arg0: i32) -> (i32, i32) {
    %c0_i32 = arith.constant 0 : i32
    %c0_i32_0 = arith.constant 0 : i32
    return %c0_i32, %arg0 : i32, i32
  }
}

</mosaic_0001>

<bundles_post_ra>
// kernel: beta_prior_decoder_forward.1
= control target key start
LH: loop header
LB: loop body
LE: loop exit
PB: predicated region body
PF: predicated region fallthrough
CT: control target
= control target key end

     0   :  { %9 = vsyncpa [#allocation3], 0  ;;  %s298_s0 = inlined_call_operand.vmem [shape: f32[4], index: 0, kind: input, shape index: {}]   ;;  %s299_s1 = inlined_call_operand.vmem [shape: f32[8,128], index: 1, kind: input, shape index: {}]   ;;  %s300_s2 = inlined_call_operand.vmem [shape: f32[8,128], index: 2, kind: input, shape index: {}]   ;;  %s301_s3 = inlined_call_operand.vmem [shape: f32[8,128], index: 3, kind: input, shape index: {}]   ;;  %s302_s4 = inlined_call_operand.vmem [shape: f32[8,128], index: 4, kind: output, shape index: {}]  }
   0x1   :  { %s16_s17 = sshll.u32 %s298_s0, 4  ;;  %s17_s17 = int_to_ptr.vmem [resolvable:$true] %s16_s17 }
   0x2   :  { %s195_s18 = scalar_lea.vmem %s17_s17, 16  ;;  %p200_p1 = scmp.lt.s32.totalorder %s17_s17, %s17_s17 }
   0x3   :  { %p196_p0 = scmp.ne.s32.totalorder %s17_s17, %s195_s18  ;;  %p201_p2 = scmp.lt.s32.totalorder %s195_s18, %s195_s18 }
   0x5   :  { %p202_p3 = por %p201_p2, %p200_p1 }
   0x7   :  { %p203_p4 = pnand %p202_p3, %p196_p0 }
   0x9   :  { %206 = shalt.err (!%p203_p4)
}
   0xa   :  { %s209_s19 = smov [#allocation2]  }
   0xb   :  { %19 = dma.vmem_to_smem %s17_s17, 16, %s209_s19, [#allocation3]  }
   0xc   :  { %207 = dma.done.wait [#allocation3], 16  }
   0xd   :  { %208 = vsyncadd [#allocation3], 4294967280 }
   0xe   :  { %29 = sfence }
   0xf   :  { %s167_s20 = sld [smem:[#allocation2 + $0x1]]  ;;  %v34_v0 = vld [vmem:[%s299_s1] sm:$0xff]  ;;  %s30_s25 = sld [smem:[#allocation2]] }
  0x10   :  { %v35_v1 = vsub.f32 0.0, %v34_v0  ;;  %v42_v3 = vld [vmem:[%s300_s2] sm:$0xff]  ;;  %s168_s26 = sld [smem:[#allocation2 + $0x2]] }
  0x11   :  { %v57_v59 = vld [vmem:[%s301_s3] sm:$0xff]  ;;  %s169_s3 = sld [smem:[#allocation2 + $0x3]] }
  0x12   :  { %v36_v2 = vmul.f32 1.442695, %v35_v1 }
  0x14   :  { %173 = vpow2.f32 %v36_v2  ;;  %v58_v2 = vmax.f32 %v57_v59, 0.001 }
  0x15   :  { %s41_s0 = ssub.f32 0.0, %s167_s20  ;;  %v47_v9 = vstv %s30_s25 }
  0x16   :  { %v49_v12 = vstv %s168_s26 }
  0x17   :  { %v43_v4 = vstv %s41_s0 }
  0x18   :  { %v44_v5 = vmul.f32 %v43_v4, %v42_v3 }
  0x1a   :  { %v45_v6 = vmul.f32 1.442695, %v44_v5 }
  0x1c   :  { %175 = vpow2.f32 %v45_v6 }
  0x1e   :  { %v174_v7 = vpop.eup %173 }
  0x1f   :  { %v38_v8 = vadd.f32 1.0, %v174_v7 }
  0x21   :  { %177 = vrcp.f32 %v38_v8 }
  0x26   :  { %v176_v10 = vpop.eup %175 }
  0x27   :  { %v48_v11 = vmul.f32 %v176_v10, %v47_v9 }
  0x29   :  { %v53_v15 = vsub.f32 %v47_v9, %v48_v11 }
  0x2b   :  { %v178_v13 = vpop.eup %177 }
  0x2c   :  { %v50_v14 = vmul.f32 %v178_v13, %v49_v12 }
  0x2e   :  { %v51_v16 = vadd.f32 %v50_v14, %v48_v11  ;;  %v54_v17 = vsub.f32 %v49_v12, %v50_v14  ;;  %v59_v11 = vmin.f32 %v58_v2, 0.999 }
  0x30   :  { %v244_v18 = vadd.f32 1e-15, %v51_v16  ;;  %v55_v19 = vadd.f32 %v54_v17, %v53_v15  ;;  %v65_v17 = vsub.f32 1.0, %v59_v11 }
  0x32   :  { %v246_v20 = vadd.f32 1e-15, %v55_v19  ;;  %v72_v21 = vadd.f32 60.458332, %v244_v18  ;;  %v87_v22 = vadd.f32 36.0, %v244_v18  ;;  %v274_v61 = vadd.f32 7.5, %v244_v18 }
  0x34   :  { %v73_v23 = vmul.f32 %v72_v21, %v244_v18  ;;  %v88_v24 = vmul.f32 %v87_v22, %v244_v18  ;;  %v104_v25 = vadd.f32 60.458332, %v246_v20  ;;  %v119_v26 = vadd.f32 36.0, %v246_v20 }
  0x35   :  { %v137_v6 = vadd.f32 7.5, %v246_v20  ;;  %179 = vlog2.f32 %v274_v61 }
  0x36   :  { %v74_v27 = vadd.f32 1599.0425, %v73_v23  ;;  %v89_v28 = vadd.f32 546.0, %v88_v24  ;;  %v105_v29 = vmul.f32 %v104_v25, %v246_v20  ;;  %v120_v30 = vmul.f32 %v119_v26, %v246_v20 }
  0x37   :  { %181 = vlog2.f32 %v137_v6  ;;  %v138_v24 = vadd.f32 0.5, %v244_v18 }
  0x38   :  { %v75_v31 = vmul.f32 %v74_v27, %v244_v18  ;;  %v90_v32 = vmul.f32 %v89_v28, %v244_v18  ;;  %v106_v33 = vadd.f32 1599.0425, %v105_v29  ;;  %v121_v34 = vadd.f32 546.0, %v120_v30 }
  0x3a   :  { %v76_v35 = vadd.f32 24165.51, %v75_v31  ;;  %v91_v36 = vadd.f32 4536.0, %v90_v32  ;;  %v107_v37 = vmul.f32 %v106_v33, %v246_v20  ;;  %v122_v38 = vmul.f32 %v121_v34, %v246_v20 }
  0x3b   :  { %v143_v31 = vadd.f32 0.5, %v246_v20  ;;  %v154_v34 = vmul.f32 %v246_v20, %v244_v18 }
  0x3c   :  { %v77_v39 = vmul.f32 %v76_v35, %v244_v18  ;;  %v92_v40 = vmul.f32 %v91_v36, %v244_v18  ;;  %v108_v41 = vadd.f32 24165.51, %v107_v37  ;;  %v123_v42 = vadd.f32 4536.0, %v122_v38 }
  0x3e   :  { %v78_v43 = vadd.f32 228235.22, %v77_v39  ;;  %v93_v44 = vadd.f32 22449.0, %v92_v40  ;;  %v109_v45 = vmul.f32 %v108_v41, %v246_v20  ;;  %v124_v46 = vmul.f32 %v123_v42, %v246_v20 }
  0x3f   :  { %v180_v21 = vpop.eup %179 }
  0x40   :  { %v79_v47 = vmul.f32 %v78_v43, %v244_v18  ;;  %v94_v48 = vmul.f32 %v93_v44, %v244_v18  ;;  %v110_v49 = vadd.f32 228235.22, %v109_v45  ;;  %v125_v50 = vadd.f32 22449.0, %v124_v46 }
  0x41   :  { %v140_v25 = vmul.f32 0.6931472, %v180_v21  ;;  %v182_v26 = vpop.eup %181  ;;  %v170_v43 = vadd.f32 -1.0, %v244_v18  ;;  %v171_v44 = vadd.f32 -1.0, %v246_v20 }
  0x42   :  { %v80_v51 = vadd.f32 1379496.3, %v79_v47  ;;  %v95_v52 = vadd.f32 67284.0, %v94_v48  ;;  %v111_v53 = vmul.f32 %v110_v49, %v246_v20  ;;  %v126_v54 = vmul.f32 %v125_v50, %v246_v20 }
  0x43   :  { %v141_v30 = vmul.f32 %v140_v25, %v138_v24  ;;  %v145_v32 = vmul.f32 0.6931472, %v182_v26 }
  0x44   :  { %v81_v55 = vmul.f32 %v80_v51, %v244_v18  ;;  %v96_v56 = vmul.f32 %v95_v52, %v244_v18  ;;  %v112_v57 = vadd.f32 1379496.3, %v111_v53  ;;  %v127_v58 = vadd.f32 67284.0, %v126_v54 }
  0x45   :  { %v142_v38 = vadd.f32 1.837877, %v141_v30  ;;  %v146_v39 = vmul.f32 %v145_v32, %v143_v31  ;;  %v70_v54 = vstv %s169_s3 }
  0x46   :  { %v97_v60 = vadd.f32 118124.0, %v96_v56  ;;  %v113_v62 = vmul.f32 %v112_v57, %v246_v20  ;;  %v128_v63 = vmul.f32 %v127_v58, %v246_v20  ;;  %v82_v0 = vadd.f32 5210869.0, %v81_v55 }
  0x47   :  { %v147_v46 = vadd.f32 %v146_v39, %v142_v38 }
  0x48   :  { %v98_v1 = vmul.f32 %v97_v60, %v244_v18  ;;  %v129_v3 = vadd.f32 118124.0, %v128_v63  ;;  %v114_v5 = vadd.f32 5210869.0, %v113_v62  ;;  %v83_v8 = vmul.f32 %v82_v0, %v244_v18 }
  0x49   :  { %v148_v49 = vsub.f32 %v147_v46, %v274_v61 }
  0x4a   :  { %v99_v4 = vadd.f32 109584.0, %v98_v1  ;;  %v130_v7 = vmul.f32 %v129_v3, %v246_v20  ;;  %v115_v13 = vmul.f32 %v114_v5, %v246_v20  ;;  %v84_v15 = vadd.f32 11246929.0, %v83_v8 }
  0x4b   :  { %v149_v52 = vsub.f32 %v148_v49, %v137_v6 }
  0x4c   :  { %v100_v9 = vmul.f32 %v99_v4, %v244_v18  ;;  %v131_v10 = vadd.f32 109584.0, %v130_v7  ;;  %v116_v19 = vadd.f32 11246929.0, %v115_v13  ;;  %v85_v22 = vmul.f32 %v84_v15, %v244_v18 }
  0x4e   :  { %v101_v12 = vadd.f32 40320.0, %v100_v9  ;;  %v132_v14 = vmul.f32 %v131_v10, %v246_v20  ;;  %v117_v23 = vmul.f32 %v116_v19, %v246_v20  ;;  %v86_v27 = vadd.f32 10619610.0, %v85_v22 }
  0x50   :  { %183 = vrcp.f32 %v101_v12  ;;  %v133_v16 = vadd.f32 40320.0, %v132_v14  ;;  %v118_v29 = vadd.f32 10619610.0, %v117_v23 }
  0x52   :  { %185 = vrcp.f32 %v133_v16 }
  0x53   :  { %187 = vlog2.f32 %v59_v11 }
  0x54   :  { %189 = vlog2.f32 %v65_v17 }
  0x55   :  { %191 = vlog2.f32 %v154_v34 }
  0x5a   :  { %v184_v28 = vpop.eup %183 }
  0x5b   :  { %v103_v33 = vmul.f32 %v184_v28, %v86_v27 }
  0x5c   :  { %v186_v35 = vpop.eup %185 }
  0x5d   :  { %v135_v36 = vmul.f32 %v186_v35, %v118_v29  ;;  %v188_v37 = vpop.eup %187 }
  0x5e   :  { %v190_v40 = vpop.eup %189  ;;  %v62_v42 = vmul.f32 0.6931472, %v188_v37 }
  0x5f   :  { %v150_v41 = vmul.f32 %v135_v36, %v103_v33  ;;  %v67_v45 = vmul.f32 0.6931472, %v190_v40  ;;  %v192_v50 = vpop.eup %191 }
  0x60   :  { %v63_v47 = vmul.f32 %v170_v43, %v62_v42  ;;  %v156_v56 = vmul.f32 0.6931472, %v192_v50 }
  0x61   :  { %193 = vlog2.f32 %v150_v41  ;;  %v68_v48 = vmul.f32 %v171_v44, %v67_v45 }
  0x63   :  { %v69_v51 = vadd.f32 %v68_v48, %v63_v47 }
  0x65   :  { %v71_v57 = vadd.f32 %v70_v54, %v69_v51 }
  0x6b   :  { %v194_v53 = vpop.eup %193 }
  0x6c   :  { %v152_v55 = vmul.f32 0.6931472, %v194_v53 }
  0x6e   :  { %v153_v58 = vadd.f32 %v152_v55, %v149_v52 }
  0x70   :  { %v157_v59 = vsub.f32 %v153_v58, %v156_v56 }
  0x72   :  { %v158_v18 = vsub.f32 %v71_v57, %v157_v59 }
  0x74   :  { %v159_v60 = vsub.f32 0.0, %v158_v18 }
  0x76   :  { %v160_v20 = vmin.f32 %v159_v60, 50.0 }
  0x78   :  { %161 = vst [vmem:[%s302_s4] sm:$0xff] %v160_v20 }
  0x79   :  { %166 = vsyncpa [#allocation3], 1 }

</bundles_post_ra>
